<compile_context>
chip_gen: v6e
topology: v6e:2x2x1
jax: 0.10.0
libtpu: 0.0.40
codegen_flags: <defaults>
</compile_context>

<pallas_src>
import functools

import jax
import jax.numpy as jnp
from jax.experimental import pallas as pl
from jax.experimental.pallas import tpu as pltpu


_CHUNK_ROWS = 256  # in-kernel accumulation chunk (bounds temporaries to ~1 MiB)


def _round_up(x, m):
    return ((x + m - 1) // m) * m


def _pow(x, gamma):
    """Small-integer gamma avoids the EUP exp(gamma*log(x)) lowering."""
    if gamma == 1.0:
        return x
    if gamma == 2.0:
        return x * x
    if gamma == 3.0:
        return x * x * x
    return jnp.power(x, gamma)


def _vmem_capacity_bytes():
    try:
        info = pltpu.get_tpu_info()
        cap = getattr(info, "vmem_capacity_bytes", None)
        if cap:
            return int(cap)
    except Exception:
        pass
    return 64 << 20  # conservative default (v7x per-TensorCore)


def _choose_block_rows(B, C, itemsize, target_tile_bytes, min_steps=8):
    """Pick a batch tile: big enough to amortize per-step overhead, small enough
    that the grid has >= min_steps (pipelining + megacore), multiple of 8, and a
    multiple of _CHUNK_ROWS once it exceeds it."""
    b8 = _round_up(B, 8)
    # Row budget from the per-input tile byte budget (native dtype).
    budget = max(8, (target_tile_bytes // max(1, C * itemsize)) // 8 * 8)
    # Keep >= min_steps grid steps so the BlockSpec pipeline can overlap DMA/compute.
    per_step = max(8, _round_up(-(-b8 // min_steps), 8))
    rows = max(8, min(budget, per_step))
    gran = 8
    if rows > _CHUNK_ROWS:
        gran = _CHUNK_ROWS
        rows = (rows // _CHUNK_ROWS) * _CHUNK_ROWS
    # Prefer an even number of grid steps (v7x has 2 TensorCores sharing the grid).
    nb = -(-B // rows)
    if nb > 1 and nb % 2 == 1:
        rows_even = max(gran, _round_up(-(-b8 // (nb + 1)), gran))
        if (-(-B // rows_even)) % 2 == 0:
            rows = rows_even
    return rows


def _focal_loss_kernel(x_ref, t_ref, out_ref, *, gamma, alpha, epsilon,
                       with_logit, binary_targets, chunk_rows, batch_size,
                       mask_tail):
    block_rows, C = x_ref.shape
    num_chunks = block_rows // chunk_rows
    row_base = pl.program_id(0) * block_rows

    if mask_tail:
        # Hoisted: loop-invariant row iota for the tail mask.
        row_iota = jax.lax.broadcasted_iota(jnp.int32, (chunk_rows, C), 0)

    def chunk_loss(start):
        p = x_ref[pl.ds(start, chunk_rows), :].astype(jnp.float32)
        t = t_ref[pl.ds(start, chunk_rows), :].astype(jnp.float32)

        if with_logit:
            # TODO(synk): optionally fuse sigmoid+log via -softplus(-x_signed);
            # better numerics for extreme logits but deviates from the reference's
            # log(sigmoid(x) + eps) by the eps placement, so keep exact form here.
            p = jax.nn.sigmoid(p)

        if binary_targets:
            # Exact rewrite of the two-term loss for t in {0, 1}: one log + one
            # pow per element; selects/fmas are VPU ops.
            pos = t > 0.5
            p_t = jnp.where(pos, p, 1.0 - p)
            one_minus_pt = 1.0 - p_t
            # -alpha_t:  t=1 -> -alpha ;  t=0 -> -(1-alpha)   (single fma, no select)
            neg_alpha_t = (alpha - 1.0) + t * (1.0 - 2.0 * alpha)
            loss = neg_alpha_t * _pow(one_minus_pt, gamma) * jnp.log(p_t + epsilon)
        else:
            # General (soft-label-safe) two-term form, identical to the reference.
            loss = -alpha * t * _pow(1.0 - p, gamma) * jnp.log(p + epsilon)
            loss += (-(1.0 - alpha) * (1.0 - t) * _pow(p, gamma)
                     * jnp.log(1.0 - p + epsilon))

        if mask_tail:
            # Tail rows of the (possibly partial) last block read unspecified
            # data; zero their contribution.  (NaNs in the masked lane are fine:
            # jnp.where is a select, not arithmetic.)
            valid = (row_base + start + row_iota) < batch_size
            loss = jnp.where(valid, loss, 0.0)

        # Reduce (chunk_rows, C) -> (8, C) by summing whole vregs (pure VPU adds,
        # no cross-lane movement).  Final scalar collapse happens in the wrapper.
        return loss.reshape(chunk_rows // 8, 8, C).sum(axis=0)

    if num_chunks == 1:
        out_ref[...] = chunk_loss(0)
    else:
        out_ref[...] = jnp.zeros_like(out_ref)

        def body(c, carry):
            start = pl.multiple_of(c * chunk_rows, chunk_rows)
            out_ref[...] += chunk_loss(start)
            return carry

        jax.lax.fori_loop(0, num_chunks, body, 0, unroll=num_chunks <= 8)


def binary_focal_loss(logits, target, *, gamma=2.0, alpha=0.25, epsilon=1e-9,
                      with_logit=False, binary_targets=True,
                      target_tile_bytes=None, block_rows=None, chunk_rows=None):
    """Mean binary focal loss over all elements of [B, C] inputs.

    binary_targets=True assumes targets are exactly {0, 1} (multi-hot); pass
    binary_targets=False for soft labels (uses the exact two-term reference form).
    """
    assert logits.shape == target.shape and logits.ndim == 2
    B, C = logits.shape
    total_elems = B * C

    x_isize = jnp.dtype(logits.dtype).itemsize
    t_isize = jnp.dtype(target.dtype).itemsize

    vmem_cap = _vmem_capacity_bytes()
    if target_tile_bytes is None:
        # v5e/v6e (128 MiB VMEM) -> 8 MiB per-input tile; v7x (64 MiB) -> 4 MiB.
        target_tile_bytes = int(min(8 << 20, vmem_cap // 16))

    if block_rows is None:
        block_rows = _choose_block_rows(B, C, max(x_isize, t_isize),
                                        target_tile_bytes)
    if chunk_rows is None:
        chunk_rows = min(block_rows, _CHUNK_ROWS)
    assert block_rows % 8 == 0 and chunk_rows % 8 == 0
    assert block_rows % chunk_rows == 0

    num_blocks = pl.cdiv(B, block_rows)
    mask_tail = (B % block_rows) != 0

    # 2 double-buffered copies of each input tile + chunk temporaries + headroom.
    # TODO(synk): for very large C add a second grid axis over the class dim so
    # tiles stay square-ish and within the v7x VMEM budget.
    tile_bytes = block_rows * C * (x_isize + t_isize)
    vmem_limit = int(min(max(2 * tile_bytes + (8 << 20), 16 << 20),
                         int(vmem_cap * 0.75)))

    kernel = functools.partial(
        _focal_loss_kernel,
        gamma=gamma, alpha=alpha, epsilon=epsilon,
        with_logit=with_logit, binary_targets=binary_targets,
        chunk_rows=chunk_rows, batch_size=B, mask_tail=mask_tail)

    cost = pl.CostEstimate(
        flops=12 * total_elems,
        transcendentals=(2 if with_logit else 1) * total_elems,
        bytes_accessed=total_elems * (x_isize + t_isize)
                       + int(num_blocks) * 8 * C * 4,
    )

    partials = pl.pallas_call(
        kernel,
        out_shape=jax.ShapeDtypeStruct((int(num_blocks) * 8, C), jnp.float32),
        grid_spec=pltpu.PrefetchScalarGridSpec(
            num_scalar_prefetch=0,
            grid=(int(num_blocks),),
            in_specs=[
                pl.BlockSpec((block_rows, C), lambda i: (i, 0)),
                pl.BlockSpec((block_rows, C), lambda i: (i, 0)),
            ],
            out_specs=pl.BlockSpec((8, C), lambda i: (i, 0)),
        ),
        compiler_params=pltpu.CompilerParams(
            dimension_semantics=("parallel",),   # steps independent -> megacore OK
            vmem_limit_bytes=vmem_limit,
        ),
        cost_estimate=cost,
    )(logits, target)

    return jnp.sum(partials) / jnp.float32(total_elems)


def _reference(logits, target, gamma=2.0, alpha=0.25, epsilon=1e-9,
               with_logit=False):
    logits = logits.astype(jnp.float32)
    target = target.astype(jnp.float32)
    if with_logit:
        logits = jax.nn.sigmoid(logits)
    loss = -alpha * target * jnp.power(1.0 - logits, gamma) * jnp.log(logits + epsilon)
    loss += (-(1.0 - alpha) * (1.0 - target) * jnp.power(logits, gamma)
             * jnp.log(1.0 - logits + epsilon))
    return jnp.mean(loss)


if __name__ == "__main__":
    key = jax.random.PRNGKey(0)
    k_x, k_t, k_x2, k_t2, k_x3, k_t3, k_x4, k_t4 = jax.random.split(key, 8)

    # Case 1: [batch_size=16, num_cls=128], probabilities (with_logit=False).
    B, C = 16, 128
    probs = jax.nn.sigmoid(jax.random.normal(k_x, (B, C), dtype=jnp.float32))
    target = (jax.random.uniform(k_t, (B, C)) > 0.5).astype(jnp.float32)
    out = jax.block_until_ready(binary_focal_loss(probs, target))
    ref = _reference(probs, target)
    assert jnp.allclose(out, ref, rtol=1e-5, atol=1e-6), (out, ref)

    # Case 2: non-multiple-of-8 batch exercises the in-kernel tail masking.
    B2, C2 = 10, 128
    probs2 = jax.nn.sigmoid(jax.random.normal(k_x2, (B2, C2), dtype=jnp.float32))
    target2 = (jax.random.uniform(k_t2, (B2, C2)) > 0.5).astype(jnp.float32)
    out2 = jax.block_until_ready(binary_focal_loss(probs2, target2))
    ref2 = _reference(probs2, target2)
    assert jnp.allclose(out2, ref2, rtol=1e-5, atol=1e-6), (out2, ref2)

    # Case 3: bf16 inputs stay bf16 in HBM, cast to f32 inside the kernel.
    B3, C3 = 32, 128
    probs3 = jax.nn.sigmoid(jax.random.normal(k_x3, (B3, C3))).astype(jnp.bfloat16)
    target3 = (jax.random.uniform(k_t3, (B3, C3)) > 0.5).astype(jnp.float32)
    out3 = jax.block_until_ready(binary_focal_loss(probs3, target3))
    ref3 = _reference(probs3, target3)
    assert jnp.allclose(out3, ref3, rtol=1e-5, atol=1e-6), (out3, ref3)

    # Case 4: force the chunked fori-loop accumulation + tail mask path.
    B4, C4 = 40, 128
    probs4 = jax.nn.sigmoid(jax.random.normal(k_x4, (B4, C4), dtype=jnp.float32))
    target4 = (jax.random.uniform(k_t4, (B4, C4)) > 0.5).astype(jnp.float32)
    out4 = jax.block_until_ready(
        binary_focal_loss(probs4, target4, block_rows=32, chunk_rows=8))
    ref4 = _reference(probs4, target4)
    assert jnp.allclose(out4, ref4, rtol=1e-5, atol=1e-6), (out4, ref4)

    print("KERNEL_OK")
</pallas_src>

<mosaic_0001>
module attributes {stable_mosaic.version = 11 : i64} {
  func.func @_focal_loss_kernel(%arg0: i32, %arg1: memref<8x128xf32, #tpu.memory_space<vmem>>, %arg2: memref<8x128xf32, #tpu.memory_space<vmem>>, %arg3: memref<8x128xf32, #tpu.memory_space<vmem>>) attributes {dimension_semantics = [#tpu.dimension_semantics<parallel>], iteration_bounds = array<i64: 2>, scalar_prefetch = 0 : i64, scratch_operands = 0 : i64, tpu.core_type = #tpu.core_type<tc>, window_params = [{transform_indices = @transform_0, window_bounds = array<i64: 8, 128>}, {transform_indices = @transform_1, window_bounds = array<i64: 8, 128>}, {transform_indices = @transform_2, window_bounds = array<i64: 8, 128>}]} {
    %c0 = arith.constant 0 : index
    %c0_0 = arith.constant 0 : index
    %0 = vector.load %arg1[%c0, %c0_0] : memref<8x128xf32, #tpu.memory_space<vmem>>, vector<8x128xf32>
    %c0_1 = arith.constant 0 : index
    %c0_2 = arith.constant 0 : index
    %1 = vector.load %arg2[%c0_1, %c0_2] : memref<8x128xf32, #tpu.memory_space<vmem>>, vector<8x128xf32>
    %cst = arith.constant 5.000000e-01 : f32
    %2 = vector.broadcast %cst : f32 to vector<8x128xf32>
    %3 = arith.cmpf ogt, %1, %2 : vector<8x128xf32>
    %cst_3 = arith.constant 1.000000e+00 : f32
    %4 = vector.broadcast %cst_3 : f32 to vector<8x128xf32>
    %5 = arith.subf %4, %0 : vector<8x128xf32>
    %6 = arith.select %3, %0, %5 : vector<8x128xi1>, vector<8x128xf32>
    %cst_4 = arith.constant 1.000000e+00 : f32
    %7 = vector.broadcast %cst_4 : f32 to vector<8x128xf32>
    %8 = arith.subf %7, %6 : vector<8x128xf32>
    %cst_5 = arith.constant 5.000000e-01 : f32
    %9 = vector.broadcast %cst_5 : f32 to vector<8x128xf32>
    %10 = arith.mulf %1, %9 : vector<8x128xf32>
    %cst_6 = arith.constant -7.500000e-01 : f32
    %11 = vector.broadcast %cst_6 : f32 to vector<8x128xf32>
    %12 = arith.addf %11, %10 : vector<8x128xf32>
    %13 = arith.mulf %8, %8 : vector<8x128xf32>
    %14 = arith.mulf %12, %13 : vector<8x128xf32>
    %cst_7 = arith.constant 9.99999971E-10 : f32
    %15 = vector.broadcast %cst_7 : f32 to vector<8x128xf32>
    %16 = arith.addf %6, %15 : vector<8x128xf32>
    %17 = math.log %16 : vector<8x128xf32>
    %18 = arith.mulf %14, %17 : vector<8x128xf32>
    %19 = vector.shape_cast %18 : vector<8x128xf32> to vector<1x8x128xf32>
    %cst_8 = arith.constant dense<0.000000e+00> : vector<8x128xf32>
    %20 = vector.multi_reduction <add>, %19, %cst_8 [0] : vector<1x8x128xf32> to vector<8x128xf32>
    %c0_9 = arith.constant 0 : index
    %c0_10 = arith.constant 0 : index
    %21 = vector.load %arg3[%c0_9, %c0_10] : memref<8x128xf32, #tpu.memory_space<vmem>>, vector<8x128xf32>
    tpu.vector_store %arg3[%c0_9, %c0_10], %20 {strides = array<i32>} : memref<8x128xf32, #tpu.memory_space<vmem>>, vector<8x128xf32>,
    return
  }
  func.func @transform_0(%arg0: i32) -> (i32, i32) {
    %c0_i32 = arith.constant 0 : i32
    %c0_i32_0 = arith.constant 0 : i32
    return %arg0, %c0_i32 : i32, i32
  }
  func.func @transform_1(%arg0: i32) -> (i32, i32) {
    %c0_i32 = arith.constant 0 : i32
    %c0_i32_0 = arith.constant 0 : i32
    return %arg0, %c0_i32 : i32, i32
  }
  func.func @transform_2(%arg0: i32) -> (i32, i32) {
    %c0_i32 = arith.constant 0 : i32
    %c0_i32_0 = arith.constant 0 : i32
    return %arg0, %c0_i32 : i32, i32
  }
}

</mosaic_0001>

<bundles_post_ra>
// kernel: tpu_custom_call.1
= control target key start
LH: loop header
LB: loop body
LE: loop exit
PB: predicated region body
PF: predicated region fallthrough
CT: control target
= control target key end

     0   :  { %7 = vsyncpa [#allocation3], 0  ;;  %s730_s0 = inlined_call_operand.hbm [shape: f32[16,128], index: 0, kind: input, shape index: {}]   ;;  %s731_s1 = inlined_call_operand.hbm [shape: f32[16,128], index: 1, kind: input, shape index: {}]   ;;  %s732_s2 = inlined_call_operand.hbm [shape: f32[16,128], index: 2, kind: output, shape index: {}]  }
   0x1   :  { %9 = vsyncpa [#allocation3 + $0x1], 0 }
   0x2   :  { %10 = vsyncpa [#allocation6], 0 }
   0x3   :  { %12 = vsyncpa [#allocation6 + $0x1], 0 }
   0x4   :  { %13 = vsyncpa [#allocation4], 0 }
   0x5   :  { %15 = vsyncpa [#allocation4 + $0x1], 0  ;;  %s531_s9 = smov 0   ;;  %s533_s10 = smov 0  }
   0x6   :  { %s535_s11 = smov 0   ;;  %s537_s12 = smov 0  }
   0x7 LB: > { %s552_s13 = sadd.s32 4294967295, %s511_s12   ;;  %s319_s14 = sadd.s32 4294967294, %s511_s12   ;;  %s511_s12 = sphi %s537_s12, %s751_s12   ;;  %s507_s11 = sphi %s535_s11, %s750_s11   ;;  %s503_s10 = sphi %s533_s10, %s749_s10   ;;  %s499_s9 = sphi %s531_s9, %s748_s9  }
   0x8   : > { %s556_s15 = sadd.s32 1, %s511_s12   ;;  %s28_s16 = sadd.s32 1, %s507_s11 }
   0x9   : > { %s25_s17 = ssub.s32 %s511_s12, %s556_s15  ;;  %p35_p0 = scmp.ne.s32.totalorder %s507_s11, %s503_s10 }
   0xa   : > { %p26_p1 = scmp.eq.s32.totalorder %s25_s17, 0  ;;  %p36_p2 = scmp.eq.s32.totalorder %s511_s12, 0 }
   0xb   : > { %p41_p3 = scmp.ne.s32.totalorder %s503_s10, %s499_s9  ;;  %p42_p4 = scmp.eq.s32.totalorder %s552_s13, 0 }
   0xc   : > { %s568_s18 = scalar_select %p26_p1, %s507_s11, %s28_s16  }
   0xd   : > { %p570_p5 = por %p36_p2, %p35_p0  ;;  %p574_p6 = por %p42_p4, %p41_p3 }
   0xe   : > { %p91_p7 = scmp.eq.s32.totalorder %s552_s13, 1  ;;  %p97_p8 = scmp.eq.s32.totalorder %s319_s14, 1 }
   0xf   : > { %s736_s20 = scalar_select %p574_p6, 1, 0 }
  0x10   : > { %p351_p10 = scmp.lt.s32.totalorder %s511_s12, 2  ;;  %p581_p11 = por %p91_p7, %p35_p0 }
  0x11   : > { %p585_p12 = por %p97_p8, %p41_p3  ;;  %s590_s23 = sand.u32 1, %s507_s11  }
  0x12   : > { %s737_s21 = scalar_select %p581_p11, 1, 0 }
  0x13   : > { %s738_s22 = scalar_select %p585_p12, 1, 0 }
  0x14   : > { %s323_s24 = sshll.u32 %s511_s12, 7  ;;  %s322_s25 = sshll.u32 %s590_s23, 3 }
  0x15   : > { %s599_s28 = scalar_lea.hbm %s730_s0, %s323_s24  ;;  %s121_s29 = scalar_lea.vmem [#allocation2], %s322_s25 }
  0x16   : > { %s128_s30 = sshll.u32 %s121_s29, 4  ;;  %p605_p13 = pnand %p351_p10, %p570_p5  ;;  %s609_s30 = int_to_ptr.vmem [resolvable:$true] %s128_s30 }
  0x17   : > { %s118_s4 = scalar_lea.sflag [#allocation3], %s590_s23  ;;  %s387_s5 = scalar_lea.hbm %s599_s28, 128 }
  0x18   : > { %p388_p2 = scmp.ne.s32.totalorder %s599_s28, %s387_s5  ;;  %p389_p3 = pneg %p605_p13 }
  0x19   : > { %s392_s8 = scalar_lea.hbm %s730_s0, 256  ;;  %p393_p5 = scmp.lt.s32.totalorder %s599_s28, %s730_s0 }
  0x1a   : > { %p390_p4 = pnand %p389_p3, %p388_p2  ;;  %p394_p8 = scmp.lt.s32.totalorder %s392_s8, %s387_s5 }
  0x1c   : > { %p391_p7 = pneg %p390_p4  ;;  %p395_p10 = por %p394_p8, %p393_p5 }
  0x1e   : > { %p396_p9 = pnand %p395_p10, %p391_p7 }
  0x20   : > { %399 = shalt.err (!%p396_p9)
}
  0x21   : > { %s400_s17 = scalar_lea.vmem %s609_s30, 128  ;;  %s513_s19 = smov [#allocation2]  }
  0x22   : > { %p401_p0 = scmp.ne.s32.totalorder %s609_s30, %s400_s17  ;;  %s405_s26 = sshll.u32 %s513_s19, 4  ;;  %s406_s26 = int_to_ptr.vmem [resolvable:$false] %s405_s26 }
  0x23   : > { %s407_s27 = scalar_lea.vmem %s406_s26, 256  ;;  %p408_p1 = scmp.lt.s32.totalorder %s609_s30, %s406_s26 }
  0x24   : > { %p403_p2 = pnand %p401_p0, %p389_p3  ;;  %p409_p12 = scmp.lt.s32.totalorder %s407_s27, %s400_s17 }
  0x26   : > { %p404_p4 = pneg %p403_p2  ;;  %p410_p11 = por %p409_p12, %p408_p1 }
  0x28   : > { %p411_p5 = pnand %p410_p11, %p404_p4 }
  0x2a   : > { %414 = shalt.err (!%p411_p5)
}
  0x2b   : > { %343 = dma.hbm_to_vmem [thread:$0]  (!%p605_p13), %s599_s28, 128, %s609_s30, %s118_s4  }
  0x2c   : > { %p740_p9 = scmp.lt.s32.totalorder %s511_s12, 3  ;;  %p741_p0 = scmp.ge.s32.totalorder %s511_s12, 1 }
  0x2d   : > { %s651_s7 = scalar_lea.hbm %s731_s1, %s323_s24  ;;  %s139_s8 = scalar_lea.vmem [#allocation5], %s322_s25 }
  0x2e   : > { %p642_p7 = pnand %p741_p0, %p740_p9  ;;  %s146_s14 = sshll.u32 %s139_s8, 4  ;;  %s147_s14 = int_to_ptr.vmem [resolvable:$true] %s146_s14 }
  0x2f   : > { %s136_s28 = scalar_lea.sflag [#allocation6], %s590_s23  ;;  %s415_s30 = scalar_lea.hbm %s651_s7, 128 }
  0x30   : > { %s742_s29 = scalar_select %p642_p7, 1, 0 }
  0x31   : > { %p416_p11 = scmp.ne.s32.totalorder %s651_s7, %s415_s30  ;;  %s420_s17 = scalar_lea.hbm %s731_s1, 256 }
  0x32   : > { %p421_p8 = scmp.lt.s32.totalorder %s651_s7, %s731_s1  ;;  %p422_p10 = scmp.lt.s32.totalorder %s420_s17, %s415_s30 }
  0x33   : > { %p418_p12 = pnand %p416_p11, %p389_p3 }
  0x34   : > { %p423_p2 = por %p422_p10, %p421_p8 }
  0x35   : > { %p419_p1 = pneg %p418_p12 }
  0x37   : > { %p424_p4 = pnand %p423_p2, %p419_p1 }
  0x39   : > { %427 = shalt.err (!%p424_p4)
}
  0x3a   : > { %s428_s25 = scalar_lea.vmem %s147_s14, 128  ;;  %s514_s23 = smov [#allocation5]  }
  0x3b   : > { %p429_p5 = scmp.ne.s32.totalorder %s147_s14, %s428_s25  ;;  %s433_s26 = sshll.u32 %s514_s23, 4  ;;  %s434_s26 = int_to_ptr.vmem [resolvable:$false] %s433_s26 }
  0x3c   : > { %s435_s27 = scalar_lea.vmem %s434_s26, 256  ;;  %p436_p11 = scmp.lt.s32.totalorder %s147_s14, %s434_s26 }
  0x3d   : > { %p431_p9 = pnand %p429_p5, %p389_p3  ;;  %p437_p12 = scmp.lt.s32.totalorder %s435_s27, %s428_s25 }
  0x3f   : > { %p432_p0 = pneg %p431_p9  ;;  %p438_p6 = por %p437_p12, %p436_p11 }
  0x41   : > { %p439_p7 = pnand %p438_p6, %p432_p0 }
  0x43   : > { %442 = shalt.err (!%p439_p7)
}
  0x44   : > { %346 = dma.hbm_to_vmem [thread:$0]  (!%p605_p13), %s651_s7, 128, %s147_s14, %s136_s28  }
  0x45   : > { %p743_p1 = scmp.ne.s32.totalorder %s742_s29, 0 }
  0x46   : > { %s677_s5 = sand.u32 (!%p743_p1), 1, %s503_s10   ;;  %p744_p6 = scmp.ne.s32.totalorder (!%p743_p1), %s736_s20, 0 }
  0x47   : > { %155 = sbr.rel (%p743_p1) target bundleno = 116 (0x74), region = 28  ;;  %s680_s6 = sshll.u32 (!%p743_p1), %s677_s5, 3 }
  0x48   : > { %s158_s8 = scalar_lea.sflag (!%p743_p1), [#allocation3], %s677_s5  ;;  %s161_s30 = scalar_lea.vmem (!%p743_p1), [#allocation2], %s680_s6 }
  0x4c   : > { %486 = dma.done.wait (%p744_p6), %s158_s8, 128  }
  0x4d   : > { %488 = vsyncadd (%p744_p6), %s158_s8, 4294967168  ;;  %s167_s3 = scalar_lea.sflag [#allocation6], %s677_s5  ;;  %s170_s29 = scalar_lea.vmem [#allocation5], %s680_s6 }
  0x4e   : > { %490 = dma.done.wait (%p744_p6), %s167_s3, 128  }
  0x4f   : > { %492 = vsyncadd (%p744_p6), %s167_s3, 4294967168  ;;  %v196_v0 = vld [vmem:[%s161_s30] sm:$0xff]  ;;  %v197_v1 = vld [vmem:[%s170_s29] sm:$0xff]  ;;  %s195_s7 = scalar_lea.vmem [#allocation7], %s680_s6  ;;  %s331_s14 = sshll.u32 %s552_s13, 7 }
  0x50   : > { %vm198_vm0 = vcmp.gt.f32.partialorder %v197_v1, 0.5  ;;  %v199_v2 = vsub.f32 1.0, %v196_v0  ;;  %v202_v6 = vmul.f32 0.5, %v197_v1  ;;  %s226_s20 = sshll.u32 %s195_s7, 4  ;;  %s224_s16 = scalar_lea.hbm %s732_s2, %s331_s14  ;;  %s227_s20 = int_to_ptr.vmem [resolvable:$true] %s226_s20 }
  0x51   : > { %s213_s17 = scalar_lea.sflag [#allocation4], %s677_s5  ;;  %s443_s24 = scalar_lea.vmem %s227_s20, 128 }
  0x52   : > { %v200_v3 = vsel %vm198_vm0, %v196_v0, %v199_v2  ;;  %v203_v7 = vadd.f32 -0.75, %v202_v6  ;;  %p444_p13 = scmp.ne.s32.totalorder %s227_s20, %s443_s24  ;;  %p745_p3 = scmp.ne.s32.totalorder %s737_s21, 0 }
  0x53   : > { %v206_v4 = vadd.f32 1e-09, %v200_v3  ;;  %v201_v5 = vsub.f32 1.0, %v200_v3  ;;  %s515_s19 = smov [#allocation7]  }
  0x54   : > { %p445_p7 = pnand %p444_p13, %p745_p3  ;;  %s447_s25 = sshll.u32 %s515_s19, 4  ;;  %s448_s25 = int_to_ptr.vmem [resolvable:$false] %s447_s25 }
  0x55   : > { %385 = vlog2.f32 %v206_v4  ;;  %v204_v8 = vmul.f32 %v201_v5, %v201_v5  ;;  %s449_s23 = scalar_lea.vmem %s448_s25, 256  ;;  %p450_p10 = scmp.lt.s32.totalorder %s227_s20, %s448_s25 }
  0x56   : > { %p446_p8 = pneg %p445_p7  ;;  %p451_p2 = scmp.lt.s32.totalorder %s449_s23, %s443_s24 }
  0x57   : > { %v205_v9 = vmul.f32 %v204_v8, %v203_v7 }
  0x58   : > { %p452_p4 = por %p451_p2, %p450_p10 }
  0x5a   : > { %p453_p5 = pnand %p452_p4, %p446_p8 }
  0x62   : > { %v386_v10 = vpop.eup %385 }
  0x63   : > { %v208_v11 = vmul.f32 0.6931472, %v386_v10 }
  0x65   : > { %v209_v12 = vmul.f32 %v208_v11, %v205_v9 }
  0x67   : > { %211 = vst [vmem:[%s195_s7] sm:$0xff] %v209_v12 }
  0x68   : > { %456 = shalt.err (!%p453_p5)
}
  0x69   : > { %s457_s13 = scalar_lea.hbm %s224_s16, 128  ;;  %s461_s5 = scalar_lea.hbm %s732_s2, 256 }
  0x6a   : > { %p458_p9 = scmp.ne.s32.totalorder %s224_s16, %s457_s13  ;;  %p462_p12 = scmp.lt.s32.totalorder %s224_s16, %s732_s2 }
  0x6b   : > { %p463_p1 = scmp.lt.s32.totalorder %s461_s5, %s457_s13 }
  0x6c   : > { %p459_p0 = pnand %p458_p9, %p745_p3 }
  0x6d   : > { %p464_p6 = por %p463_p1, %p462_p12 }
  0x6e   : > { %p460_p11 = pneg %p459_p0 }
  0x70   : > { %p465_p13 = pnand %p464_p6, %p460_p11 }
  0x72   : > { %468 = shalt.err (!%p465_p13)
}
  0x73   : > { %338 = dma.vmem_to_hbm [thread:$0]  (%p745_p3), %s227_s20, 128, %s224_s16, %s213_s17  }
  0x74 PF: > { %s238_s30 = sand.u32 1, %s499_s9   ;;  %p746_p7 = scmp.ne.s32.totalorder %s738_s22, 0 }
  0x75   : > { %p747_p8 = scmp.ge.s32.totalorder %s511_s12, 2  ;;  %s239_s3 = scalar_lea.sflag [#allocation4], %s238_s30 }
  0x77   : > { %p348_p10 = pnand %p747_p8, %p746_p7 }
  0x79   : > { %p349_p2 = pneg %p348_p10 }
  0x7b   : > { %494 = dma.done.wait (%p349_p2), %s239_s3, 128  }
  0x7c   : > { %496 = vsyncadd (%p349_p2), %s239_s3, 4294967168  ;;  %p18_p4 = scmp.ge.s32.totalorder %s556_s15, 4   ;;  %s748_s9 = smov %s503_s10 }
  0x7d   : > { %s749_s10 = smov %s507_s11  ;;  %s750_s11 = smov %s568_s18 }
  0x7e   : > { %s751_s12 = smov %s556_s15  ;;  %20 = sbr.rel (!%p18_p4) target bundleno = 7 (0x7), region = 86 }
  0x83   :  { %244 = vsyncpa [#allocation3], 1 }
  0x84   :  { %246 = vsyncpa [#allocation3 + $0x1], 1 }
  0x85   :  { %247 = vsyncpa [#allocation6], 1 }
  0x86   :  { %249 = vsyncpa [#allocation6 + $0x1], 1 }
  0x87   :  { %250 = vsyncpa [#allocation4], 1 }
  0x88   :  { %252 = vsyncpa [#allocation4 + $0x1], 1 }

</bundles_post_ra>
